<compile_context>
chip_gen: v5e
topology: v5e:2x2
jax: 0.10.0
libtpu: 0.0.40
codegen_flags: <defaults>
</compile_context>

<pallas_src>
import jax
import jax.numpy as jnp
from jax.experimental import pallas as pl
from jax.experimental.pallas import tpu as pltpu


def _hbm_copy_kernel(x_hbm, o_hbm, sem):
    # Single whole-buffer HBM->HBM DMA; no VMEM round trip, no grid.
    cp = pltpu.make_async_copy(x_hbm, o_hbm, sem)
    cp.start()
    cp.wait()


def _lane_dense_view(x):
    """Pick a (rows, lanes) 2D view with a wide, 128-multiple trailing dim.

    Tries wide lane widths first so the DMA descriptor covers long contiguous
    runs; if the element count is not a multiple of 128, fall back to a flat
    1-D view (a raw HBM->HBM DMA has no (8,128) tiling requirement).
    """
    total = int(x.size)
    for lanes in (8192, 4096, 2048, 1024, 512, 256, 128):
        if total % lanes == 0:
            return (total // lanes, lanes)
    return (total,)


def pallas_identity(x):
    """Explicit Pallas identity: one HBM->HBM async DMA of the whole buffer."""
    if x.size == 0:
        return x
    orig_shape = x.shape
    view_shape = _lane_dense_view(x)
    xv = x.reshape(view_shape)

    out = pl.pallas_call(
        _hbm_copy_kernel,
        out_shape=jax.ShapeDtypeStruct(view_shape, xv.dtype),
        in_specs=[pl.BlockSpec(memory_space=pl.ANY)],
        out_specs=pl.BlockSpec(memory_space=pl.ANY),
        scratch_shapes=[pltpu.SemaphoreType.DMA(())],
    )(xv)

    return out.reshape(orig_shape)


def print_output_forward(x, text="stage2", inc_value=False, *, materialize=False):
    """Mirrors print_output.forward(x): prints, then returns x.

    materialize=False (default): zero-cost pass-through (`return x`), the
    recommended path — identity needs no HBM traffic.
    materialize=True: routes the value through the explicit Pallas HBM->HBM
    DMA copy so the op has a concrete Pallas form.
    """
    # Host-side prints mirror the torch module's behaviour.
    # TODO(synk): under jax.jit these fire only at trace time; use
    # jax.debug.print / jax.debug.callback to print at runtime inside a jit.
    print(f"{text}: {tuple(x.shape)}")
    if inc_value:
        print(x)

    if not materialize:
        return x
    return pallas_identity(x)


if __name__ == "__main__":
    key = jax.random.PRNGKey(0)
    # Small NCHW input consistent with a GAN stage-2 feature map.
    x = jax.random.normal(key, (2, 4, 16, 16), dtype=jnp.float32)

    # Default (fast) path: pure pass-through after the prints.
    y_fast = print_output_forward(x, text="print_output", inc_value=False)

    # Explicit Pallas path: single HBM->HBM DMA copy, run once on TPU.
    y_pallas = print_output_forward(
        x, text="print_output", inc_value=False, materialize=True
    )
    y_pallas = jax.block_until_ready(y_pallas)

    assert y_fast.shape == x.shape and y_fast.dtype == x.dtype
    assert y_pallas.shape == x.shape and y_pallas.dtype == x.dtype
    assert bool(jnp.all(y_fast == x))
    assert bool(jnp.all(y_pallas == x))
    print("KERNEL_OK")
</pallas_src>

<mosaic_0001>
module attributes {stable_mosaic.version = 11 : i64} {
  func.func @_hbm_copy_kernel(%arg0: memref<1x2048xf32, #tpu.memory_space<any>>, %arg1: memref<1x2048xf32, #tpu.memory_space<any>>, %arg2: memref<!tpu.dma_semaphore, #tpu.memory_space<semaphore_mem>>) attributes {dimension_semantics = [], scalar_prefetch = 0 : i64, scratch_operands = 1 : i64, tpu.core_type = #tpu.core_type<tc>} {
    tpu.enqueue_dma source(%arg0 : memref<1x2048xf32, #tpu.memory_space<any>>) target(%arg1 : memref<1x2048xf32, #tpu.memory_space<any>>) target_semaphore(%arg2 : memref<!tpu.dma_semaphore, #tpu.memory_space<semaphore_mem>>)
    tpu.wait_dma2 semaphore(%arg2 : memref<!tpu.dma_semaphore, #tpu.memory_space<semaphore_mem>>) src(%arg0 : memref<1x2048xf32, #tpu.memory_space<any>>) dst(%arg1 : memref<1x2048xf32, #tpu.memory_space<any>>)
    return
  }
}

</mosaic_0001>

<bundles_post_ra>
// kernel: tpu_custom_call.1
= control target key start
LH: loop header
LB: loop body
LE: loop exit
PB: predicated region body
PF: predicated region fallthrough
CT: control target
= control target key end

     0   :  { %s32_s12 = smov [#allocation2]   ;;  %s33_s13 = smov [#allocation3]   ;;  %s51_s0 = inlined_call_operand.hbm [shape: f32[1,2048], index: 0, kind: input, shape index: {}]   ;;  %s52_s1 = inlined_call_operand.hbm [shape: f32[1,2048], index: 1, kind: output, shape index: {}]  }
   0x1   :  { %s10_s8 = sshll.u32 %s51_s0, 4  ;;  %s12_s11 = sshll.u32 %s52_s1, 4  ;;  %s11_s8 = int_to_ptr.hbm [resolvable:$true] %s10_s8  ;;  %s13_s11 = int_to_ptr.hbm [resolvable:$true] %s12_s11 }
   0x2   :  { %s34_s14 = smov 0  }
   0x3   :  { %16 = dma.general %s11_s8, 256, %s13_s11, %s32_s12, %s33_s13, [#allocation4], %s34_s14, 0  }
   0x4   :  { %30 = dma.done.wait [#allocation2], 256 }
   0x5   :  { %31 = vsyncadd [#allocation2], 4294967040 }
   0x6   :  { %20 = vsyncmov [#allocation2] }
   0x9   :  { %s21_s15 = vpop.sfrf %20 }
   0xa   :  { %p26_p0 = scmp.ne.s32.totalorder %s21_s15, 0 }
   0xc   :  { %25 = shalt.err (%p26_p0)  }

</bundles_post_ra>
